<compile_context>
chip_gen: v6e
topology: v6e:2x2x1
jax: 0.10.0
libtpu: 0.0.40
codegen_flags: <defaults>
</compile_context>

<pallas_src>
import jax
import jax.numpy as jnp
from jax.experimental import pallas as pl
from jax.experimental.pallas import tpu as pltpu

H1, H2, OUT = 128, 10, 2
DEFAULT_TILE_B = 512  # multiple of 256 (v6e/v7x MXU) and 128 (v5e MXU)


def _round_up(n, m):
    return ((n + m - 1) // m) * m


def servernet_kernel(x_ref, w1_ref, b1_ref, w2_ref, b2_ref, w3_ref, b3_ref, o_ref):
    # fc1: bf16 operands on the MXU, f32 accumulation; bias/ReLU in f32 (VPU).
    h1 = jnp.dot(x_ref[...], w1_ref[...], preferred_element_type=jnp.float32)
    h1 = jnp.maximum(h1 + b1_ref[...], 0.0)
    # fc2 + ReLU (f32; <1% of FLOPs/bytes — leave as-is).
    h2 = jnp.dot(h1, w2_ref[...], preferred_element_type=jnp.float32)
    h2 = jnp.maximum(h2 + b2_ref[...], 0.0)
    # fc3 + sigmoid; divide goes through the EUP approx reciprocal (free slot).
    h3 = jnp.dot(h2, w3_ref[...], preferred_element_type=jnp.float32) + b3_ref[...]
    o_ref[...] = pl.reciprocal(1.0 + jnp.exp(-h3), approx=True).astype(o_ref.dtype)


def servernet_forward(x, params, tile_b=DEFAULT_TILE_B):
    """x: [B, 128*n_input] float32. params: dict of w1,b1,w2,b2,w3,b3 (f32)."""
    B, d_in = x.shape
    # Batch tile: multiple of 8 sublanes; shrink automatically for tiny batches.
    tile_b = int(min(tile_b, _round_up(max(B, 1), 8)))
    b_pad = _round_up(B, tile_b)
    if b_pad != B:
        x = jnp.pad(x, ((0, b_pad - B), (0, 0)))

    # fc1 operands to bf16 at the call boundary (halved x DMA, bf16 MXU path).
    x_bf16 = x.astype(jnp.bfloat16)
    w1 = params["w1"].astype(jnp.bfloat16)
    b1, w2, b2, w3, b3 = (params["b1"], params["w2"], params["b2"],
                          params["w3"], params["b3"])

    grid = (b_pad // tile_b,)

    # Generous VMEM budget: double-buffered x/out tiles + resident weights +
    # f32 intermediates (lane-padded). Tiny at these widths; stays well under
    # v7x's 64 MiB physical VMEM.
    est = (2 * tile_b * d_in * 2                                  # x (bf16, 2 bufs)
           + 2 * d_in * H1 * 2                                    # w1 (bf16)
           + 2 * 4 * (H1 * H2 + H2 * OUT + H1 + H2 + OUT)         # small W / biases
           + 2 * tile_b * OUT * 4                                 # out (2 bufs)
           + 3 * tile_b * H1 * 4)                                 # h1/h2/h3 scratch
    vmem_limit = int(min(max(2 * est, 8 << 20), 48 << 20))

    out = pl.pallas_call(
        servernet_kernel,
        out_shape=jax.ShapeDtypeStruct((b_pad, OUT), jnp.float32),
        grid_spec=pltpu.PrefetchScalarGridSpec(
            num_scalar_prefetch=0,
            grid=grid,
            in_specs=[
                pl.BlockSpec((tile_b, d_in), lambda i: (i, 0)),    # x: batch-tiled
                pl.BlockSpec((d_in, H1), lambda i: (0, 0)),        # weights resident
                pl.BlockSpec((1, H1), lambda i: (0, 0)),
                pl.BlockSpec((H1, H2), lambda i: (0, 0)),
                pl.BlockSpec((1, H2), lambda i: (0, 0)),
                pl.BlockSpec((H2, OUT), lambda i: (0, 0)),
                pl.BlockSpec((1, OUT), lambda i: (0, 0)),
            ],
            out_specs=pl.BlockSpec((tile_b, OUT), lambda i: (i, 0)),
        ),
        compiler_params=pltpu.CompilerParams(
            dimension_semantics=("parallel",),   # v7x: shard tiles across 2 TCs
            vmem_limit_bytes=vmem_limit,
        ),
    )(x_bf16, w1, b1, w2, b2, w3, b3)
    return out[:B]


def init_params(key, n_input):
    """Deterministic init mimicking nn.Linear default (uniform +-1/sqrt(fan_in))."""
    d_in = 128 * n_input
    dims = [(d_in, H1), (H1, H2), (H2, OUT)]
    params = {}
    for idx, (fin, fout) in enumerate(dims, start=1):
        key, kw, kb = jax.random.split(key, 3)
        bound = 1.0 / (fin ** 0.5)
        params[f"w{idx}"] = jax.random.uniform(
            kw, (fin, fout), jnp.float32, minval=-bound, maxval=bound)
        params[f"b{idx}"] = jax.random.uniform(
            kb, (1, fout), jnp.float32, minval=-bound, maxval=bound)
    return params


def reference_forward(x, params):
    h1 = jnp.maximum(x @ params["w1"] + params["b1"], 0.0)
    h2 = jnp.maximum(h1 @ params["w2"] + params["b2"], 0.0)
    return jax.nn.sigmoid(h2 @ params["w3"] + params["b3"])


if __name__ == "__main__":
    n_input = 2                       # fc1 expects 128 * n_input features
    key = jax.random.PRNGKey(0)
    key, kp = jax.random.split(key)
    params = init_params(kp, n_input)

    # Case 1: small batch, not a multiple of 8 (exercises tail padding).
    key, kx = jax.random.split(key)
    x_small = jax.random.normal(kx, (10, 128 * n_input), jnp.float32)
    out_small = jax.block_until_ready(servernet_forward(x_small, params))
    ref_small = reference_forward(x_small, params)
    assert out_small.shape == (10, 2)
    assert jnp.allclose(out_small, ref_small, atol=2e-2, rtol=2e-2), \
        "mismatch vs JAX reference (small batch)"

    # Case 2: multi-tile grid with a ragged tail (tile_b=64, B=200 -> 4 tiles).
    key, kx2 = jax.random.split(key)
    x_big = jax.random.normal(kx2, (200, 128 * n_input), jnp.float32)
    out_big = jax.block_until_ready(servernet_forward(x_big, params, tile_b=64))
    ref_big = reference_forward(x_big, params)
    assert out_big.shape == (200, 2)
    assert jnp.allclose(out_big, ref_big, atol=2e-2, rtol=2e-2), \
        "mismatch vs JAX reference (tiled batch)"

    print("KERNEL_OK")
</pallas_src>

<mosaic_0001>
module attributes {stable_mosaic.version = 11 : i64} {
  func.func @servernet_kernel(%arg0: i32, %arg1: memref<16x256xbf16, #tpu.memory_space<vmem>>, %arg2: memref<256x128xbf16, #tpu.memory_space<vmem>>, %arg3: memref<1x128xf32, #tpu.memory_space<vmem>>, %arg4: memref<128x10xf32, #tpu.memory_space<vmem>>, %arg5: memref<1x10xf32, #tpu.memory_space<vmem>>, %arg6: memref<10x2xf32, #tpu.memory_space<vmem>>, %arg7: memref<1x2xf32, #tpu.memory_space<vmem>>, %arg8: memref<16x2xf32, #tpu.memory_space<vmem>>) attributes {dimension_semantics = [#tpu.dimension_semantics<parallel>], iteration_bounds = array<i64: 1>, scalar_prefetch = 0 : i64, scratch_operands = 0 : i64, tpu.core_type = #tpu.core_type<tc>, window_params = [{transform_indices = @transform_0, window_bounds = array<i64: 16, 256>}, {pipeline_mode = #tpu.pipeline_mode<synchronous>, transform_indices = @transform_1, window_bounds = array<i64: 256, 128>}, {pipeline_mode = #tpu.pipeline_mode<synchronous>, transform_indices = @transform_2, window_bounds = array<i64: 1, 128>}, {pipeline_mode = #tpu.pipeline_mode<synchronous>, transform_indices = @transform_3, window_bounds = array<i64: 128, 10>}, {pipeline_mode = #tpu.pipeline_mode<synchronous>, transform_indices = @transform_4, window_bounds = array<i64: 1, 10>}, {pipeline_mode = #tpu.pipeline_mode<synchronous>, transform_indices = @transform_5, window_bounds = array<i64: 10, 2>}, {pipeline_mode = #tpu.pipeline_mode<synchronous>, transform_indices = @transform_6, window_bounds = array<i64: 1, 2>}, {transform_indices = @transform_7, window_bounds = array<i64: 16, 2>}]} {
    %c0 = arith.constant 0 : index
    %c0_0 = arith.constant 0 : index
    %0 = vector.load %arg1[%c0, %c0_0] : memref<16x256xbf16, #tpu.memory_space<vmem>>, vector<16x256xbf16>
    %c0_1 = arith.constant 0 : index
    %c0_2 = arith.constant 0 : index
    %1 = vector.load %arg2[%c0_1, %c0_2] : memref<256x128xbf16, #tpu.memory_space<vmem>>, vector<256x128xbf16>
    %cst = arith.constant dense<0.000000e+00> : vector<16x128xf32>
    %2 = tpu.matmul %0, %1, %cst {dimension_numbers = #tpu.dot_dimension_numbers<[1], [0], [0], [1], [0, 0, 1, 1], [], []>} : vector<16x256xbf16>, vector<256x128xbf16>, vector<16x128xf32> -> vector<16x128xf32>
    %c0_3 = arith.constant 0 : index
    %c0_4 = arith.constant 0 : index
    %3 = vector.load %arg3[%c0_3, %c0_4] : memref<1x128xf32, #tpu.memory_space<vmem>>, vector<1x128xf32>
    %4 = vector.broadcast %3 : vector<1x128xf32> to vector<16x128xf32>
    %5 = arith.addf %2, %4 : vector<16x128xf32>
    %cst_5 = arith.constant 0.000000e+00 : f32
    %6 = vector.broadcast %cst_5 : f32 to vector<16x128xf32>
    %7 = arith.maximumf %5, %6 : vector<16x128xf32>
    %c0_6 = arith.constant 0 : index
    %c0_7 = arith.constant 0 : index
    %8 = vector.load %arg4[%c0_6, %c0_7] : memref<128x10xf32, #tpu.memory_space<vmem>>, vector<128x10xf32>
    %cst_8 = arith.constant dense<0.000000e+00> : vector<16x10xf32>
    %9 = tpu.matmul %7, %8, %cst_8 {dimension_numbers = #tpu.dot_dimension_numbers<[1], [0], [0], [1], [0, 0, 1, 1], [], []>} : vector<16x128xf32>, vector<128x10xf32>, vector<16x10xf32> -> vector<16x10xf32>
    %c0_9 = arith.constant 0 : index
    %c0_10 = arith.constant 0 : index
    %10 = vector.load %arg5[%c0_9, %c0_10] : memref<1x10xf32, #tpu.memory_space<vmem>>, vector<1x10xf32>
    %11 = vector.broadcast %10 : vector<1x10xf32> to vector<16x10xf32>
    %12 = arith.addf %9, %11 : vector<16x10xf32>
    %cst_11 = arith.constant 0.000000e+00 : f32
    %13 = vector.broadcast %cst_11 : f32 to vector<16x10xf32>
    %14 = arith.maximumf %12, %13 : vector<16x10xf32>
    %c0_12 = arith.constant 0 : index
    %c0_13 = arith.constant 0 : index
    %15 = vector.load %arg6[%c0_12, %c0_13] : memref<10x2xf32, #tpu.memory_space<vmem>>, vector<10x2xf32>
    %cst_14 = arith.constant dense<0.000000e+00> : vector<16x2xf32>
    %16 = tpu.matmul %14, %15, %cst_14 {dimension_numbers = #tpu.dot_dimension_numbers<[1], [0], [0], [1], [0, 0, 1, 1], [], []>} : vector<16x10xf32>, vector<10x2xf32>, vector<16x2xf32> -> vector<16x2xf32>
    %c0_15 = arith.constant 0 : index
    %c0_16 = arith.constant 0 : index
    %17 = vector.load %arg7[%c0_15, %c0_16] : memref<1x2xf32, #tpu.memory_space<vmem>>, vector<1x2xf32>
    %18 = vector.broadcast %17 : vector<1x2xf32> to vector<16x2xf32>
    %19 = arith.addf %16, %18 : vector<16x2xf32>
    %cst_17 = arith.constant 0.000000e+00 : f32
    %20 = vector.broadcast %cst_17 : f32 to vector<16x2xf32>
    %21 = arith.subf %20, %19 : vector<16x2xf32>
    %22 = math.exp %21 : vector<16x2xf32>
    %cst_18 = arith.constant 1.000000e+00 : f32
    %23 = vector.broadcast %cst_18 : f32 to vector<16x2xf32>
    %24 = arith.addf %23, %22 : vector<16x2xf32>
    %25 = tpu.reciprocal %24 {approx = true} : vector<16x2xf32> -> vector<16x2xf32>
    %c0_19 = arith.constant 0 : index
    %c0_20 = arith.constant 0 : index
    %26 = vector.load %arg8[%c0_19, %c0_20] : memref<16x2xf32, #tpu.memory_space<vmem>>, vector<16x2xf32>
    tpu.vector_store %arg8[%c0_19, %c0_20], %25 {strides = array<i32>} : memref<16x2xf32, #tpu.memory_space<vmem>>, vector<16x2xf32>,
    return
  }
  func.func @transform_0(%arg0: i32) -> (i32, i32) {
    %c0_i32 = arith.constant 0 : i32
    %c0_i32_0 = arith.constant 0 : i32
    return %arg0, %c0_i32 : i32, i32
  }
  func.func @transform_1(%arg0: i32) -> (i32, i32) {
    %c0_i32 = arith.constant 0 : i32
    %c0_i32_0 = arith.constant 0 : i32
    %c0_i32_1 = arith.constant 0 : i32
    return %c0_i32, %c0_i32_0 : i32, i32
  }
  func.func @transform_2(%arg0: i32) -> (i32, i32) {
    %c0_i32 = arith.constant 0 : i32
    %c0_i32_0 = arith.constant 0 : i32
    %c0_i32_1 = arith.constant 0 : i32
    return %c0_i32, %c0_i32_0 : i32, i32
  }
  func.func @transform_3(%arg0: i32) -> (i32, i32) {
    %c0_i32 = arith.constant 0 : i32
    %c0_i32_0 = arith.constant 0 : i32
    %c0_i32_1 = arith.constant 0 : i32
    return %c0_i32, %c0_i32_0 : i32, i32
  }
  func.func @transform_4(%arg0: i32) -> (i32, i32) {
    %c0_i32 = arith.constant 0 : i32
    %c0_i32_0 = arith.constant 0 : i32
    %c0_i32_1 = arith.constant 0 : i32
    return %c0_i32, %c0_i32_0 : i32, i32
  }
  func.func @transform_5(%arg0: i32) -> (i32, i32) {
    %c0_i32 = arith.constant 0 : i32
    %c0_i32_0 = arith.constant 0 : i32
    %c0_i32_1 = arith.constant 0 : i32
    return %c0_i32, %c0_i32_0 : i32, i32
  }
  func.func @transform_6(%arg0: i32) -> (i32, i32) {
    %c0_i32 = arith.constant 0 : i32
    %c0_i32_0 = arith.constant 0 : i32
    %c0_i32_1 = arith.constant 0 : i32
    return %c0_i32, %c0_i32_0 : i32, i32
  }
  func.func @transform_7(%arg0: i32) -> (i32, i32) {
    %c0_i32 = arith.constant 0 : i32
    %c0_i32_0 = arith.constant 0 : i32
    return %arg0, %c0_i32 : i32, i32
  }
}

</mosaic_0001>

<bundles_post_ra>
// kernel: tpu_custom_call.1
= control target key start
LH: loop header
LB: loop body
LE: loop exit
PB: predicated region body
PF: predicated region fallthrough
CT: control target
= control target key end

     0   :  { %vm333_vm0 = vcmask 1041408   ;;  %vm326_vm1 = vcmask 80896   ;;  %vm422_vm2 = vcmask 15360   ;;  %s729_s1 = inlined_call_operand.vmem [shape: bf16[256,128], index: 1, kind: input, shape index: {}]   ;;  %s730_s0 = inlined_call_operand.vmem [shape: bf16[16,256], index: 0, kind: input, shape index: {}]   ;;  %s731_s3 = inlined_call_operand.vmem [shape: f32[128,10], index: 3, kind: input, shape index: {}]   ;;  %s732_s2 = inlined_call_operand.vmem [shape: f32[1,128], index: 2, kind: input, shape index: {}]   ;;  %s733_s5 = inlined_call_operand.vmem [shape: f32[10,2], index: 5, kind: input, shape index: {}]   ;;  %s734_s4 = inlined_call_operand.vmem [shape: f32[1,10], index: 4, kind: input, shape index: {}]   ;;  %s735_s6 = inlined_call_operand.vmem [shape: f32[1,2], index: 6, kind: input, shape index: {}]   ;;  %s736_s7 = inlined_call_operand.vmem [shape: f32[16,2], index: 7, kind: output, shape index: {}]  }
   0x1   :  { %v539_v0 = vld [vmem:[%s729_s1 + $0x78] sm:$0xff]   ;;  %v541_v2 = vld [vmem:[%s729_s1 + $0x70] sm:$0xff]   ;;  %v543_v4 = vld [vmem:[%s729_s1 + $0x68] sm:$0xff]  }
   0x2   :  { %v540_v1 = vld [vmem:[%s729_s1 + $0x38] sm:$0xff]   ;;  %453 = vmatprep.subr.bf16.mxu0 %v539_v0  ;;  %v542_v3 = vld [vmem:[%s729_s1 + $0x30] sm:$0xff]   ;;  %v544_v5 = vld [vmem:[%s729_s1 + $0x28] sm:$0xff]  }
   0x3   :  { %454 = vmatpush3.bf16.msra.mxu0 %v540_v1  ;;  %v545_v6 = vld [vmem:[%s729_s1 + $0x60] sm:$0xff]   ;;  %v547_v8 = vld [vmem:[%s729_s1 + $0x58] sm:$0xff]   ;;  %v549_v10 = vld [vmem:[%s729_s1 + $0x50] sm:$0xff]  }
   0x4   :  { %455 = vmatprep.subr.bf16.mxu0 %v541_v2  ;;  %v546_v7 = vld [vmem:[%s729_s1 + $0x20] sm:$0xff]   ;;  %v548_v9 = vld [vmem:[%s729_s1 + $0x18] sm:$0xff]   ;;  %v231_v13 = vld [vmem:[%s731_s3 + $0x70] sm:$0xff] }
   0x5   :  { %v557_v11 = vld [vmem:[%s730_s0 + $0x4] ss:$8 sps:$4 sm:$0xff]   ;;  %v232_v12 = vld [vmem:[%s731_s3 + $0x78] sm:$0xff]  ;;  %v550_v14 = vld [vmem:[%s729_s1 + $0x10] sm:$0xff]  }
   0x6   :  { %497 = vmatprep.subr.mxu1 %v232_v12  ;;  %206 = vmatprep.mubr.bf16.mxu0 %v557_v11  ;;  %v551_v15 = vld [vmem:[%s729_s1 + $0x48] sm:$0xff]   ;;  %v229_v17 = vld [vmem:[%s731_s3 + $0x60] sm:$0xff]  ;;  %v228_v20 = vld [vmem:[%s731_s3 + $0x58] sm:$0xff] }
   0x7   :  { %456 = vmatpush3.bf16.msra.mxu0 %v542_v3  ;;  %498 = vmatpush3.msra.mxu1 %v232_v12  ;;  %v230_v16 = vld [vmem:[%s731_s3 + $0x68] sm:$0xff]  ;;  %v553_v19 = vld [vmem:[%s729_s1 + $0x40] sm:$0xff]   ;;  %v227_v21 = vld [vmem:[%s731_s3 + $0x50] sm:$0xff] }
   0x8   :  { %457 = vmatprep.subr.bf16.mxu0 %v543_v4  ;;  %499 = vmatprep.subr.mxu1 %v231_v13  ;;  %v552_v18 = vld [vmem:[%s729_s1 + $0x8] sm:$0xff]   ;;  %v554_v22 = vld [vmem:[%s729_s1] sm:$0xff]   ;;  %v224_v26 = vld [vmem:[%s731_s3 + $0x38] sm:$0xff] }
   0x9   :  { %500 = vmatpush3.msra.mxu1 %v231_v13  ;;  %v226_v23 = vld [vmem:[%s731_s3 + $0x48] sm:$0xff]  ;;  %v225_v25 = vld [vmem:[%s731_s3 + $0x40] sm:$0xff]  ;;  %v223_v27 = vld [vmem:[%s731_s3 + $0x30] sm:$0xff] }
   0xa   :  { %501 = vmatprep.subr.mxu1 %v230_v16  ;;  %v555_v24 = vld [vmem:[%s730_s0] ss:$8 sps:$4 sm:$0xff]   ;;  %v220_v30 = vld [vmem:[%s731_s3 + $0x18] sm:$0xff]  ;;  %v219_v31 = vld [vmem:[%s731_s3 + $0x10] sm:$0xff] }
   0xb   :  { %458 = vmatpush3.bf16.msra.mxu0 %v544_v5  ;;  %502 = vmatpush3.msra.mxu1 %v230_v16  ;;  %v222_v28 = vld [vmem:[%s731_s3 + $0x28] sm:$0xff]  ;;  %v221_v29 = vld [vmem:[%s731_s3 + $0x20] sm:$0xff] }
   0xc   :  { %459 = vmatprep.subr.bf16.mxu0 %v545_v6  ;;  %503 = vmatprep.subr.mxu1 %v229_v17  ;;  %v218_v32 = vld [vmem:[%s731_s3 + $0x8] sm:$0xff]  ;;  %v217_v33 = vld [vmem:[%s731_s3] sm:$0xff] }
   0xd   :  { %504 = vmatpush3.msra.mxu1 %v229_v17  ;;  %v429_v36 = vld [vmem:[%s732_s2] ss:$0 sm:$0xff]  ;;  %v318_v45 = vld [vmem:[%s733_s5 + $0x8] sm:$0x3] }
   0xe   :  { %505 = vmatprep.subr.mxu1 %v228_v20  ;;  %v317_v46 = vld [vmem:[%s733_s5] sm:$0xff] }
   0xf   :  { %460 = vmatpush3.bf16.msra.mxu0 %v546_v7  ;;  %506 = vmatpush3.msra.mxu1 %v228_v20  ;;  %v448_v47 = vld [vmem:[%s734_s4] ss:$0 sm:$0xff] }
  0x10   :  { %461 = vmatprep.subr.bf16.mxu0 %v547_v8  ;;  %507 = vmatprep.subr.mxu1 %v227_v21  ;;  %v449_v54 = vld [vmem:[%s735_s6] ss:$0 sm:$0xff] }
  0x11   :  { %508 = vmatpush3.msra.mxu1 %v227_v21 }
  0x12   :  { %509 = vmatprep.subr.mxu1 %v226_v23 }
  0x13   :  { %462 = vmatpush3.bf16.msra.mxu0 %v548_v9  ;;  %510 = vmatpush3.msra.mxu1 %v226_v23 }
  0x14   :  { %463 = vmatprep.subr.bf16.mxu0 %v549_v10  ;;  %511 = vmatprep.subr.mxu1 %v225_v25 }
  0x15   :  { %512 = vmatpush3.msra.mxu1 %v225_v25 }
  0x16   :  { %513 = vmatprep.subr.mxu1 %v224_v26 }
  0x17   :  { %464 = vmatpush3.bf16.msra.mxu0 %v550_v14  ;;  %514 = vmatpush3.msra.mxu1 %v224_v26 }
  0x18   :  { %465 = vmatprep.subr.bf16.mxu0 %v551_v15  ;;  %515 = vmatprep.subr.mxu1 %v223_v27 }
  0x19   :  { %516 = vmatpush3.msra.mxu1 %v223_v27 }
  0x1a   :  { %517 = vmatprep.subr.mxu1 %v222_v28 }
  0x1b   :  { %466 = vmatpush3.bf16.msra.mxu0 %v552_v18  ;;  %518 = vmatpush3.msra.mxu1 %v222_v28 }
  0x1c   :  { %467 = vmatprep.subr.bf16.mxu0 %v553_v19  ;;  %519 = vmatprep.subr.mxu1 %v221_v29 }
  0x1d   :  { %520 = vmatpush3.msra.mxu1 %v221_v29 }
  0x1e   :  { %521 = vmatprep.subr.mxu1 %v220_v30 }
  0x1f   :  { %468 = vmatpush3.bf16.msra.mxu0 %v554_v22  ;;  %522 = vmatpush3.msra.mxu1 %v220_v30 }
  0x20   :  { %523 = vmatprep.subr.mxu1 %v219_v31 }
  0x21   :  { %524 = vmatpush3.msra.mxu1 %v219_v31 }
  0x22   :  { %207 = vmatmul.mubr.bf16.vlgmr.msra.gmra.mxu0 %v555_v24  ;;  %525 = vmatprep.subr.mxu1 %v218_v32 }
  0x23   :  { %526 = vmatpush3.msra.mxu1 %v218_v32 }
  0x24   :  { %527 = vmatprep.subr.mxu1 %v217_v33 }
  0x25   :  { %528 = vmatpush3.msra.mxu1 %v217_v33 }
  0x26   :  { %532 = vmatprep.subr.msk.mxu1 %vm333_vm0, %v318_v45 }
  0xe2   :  { %v469_v34 = vpop.f32.mrf.mxu0 }
  0xe4   :  { %v470_v35 = vpop.f32.mrf.mxu0 }
  0xe5   :  { %v471_v37 = vadd.f32 %v470_v35, %v469_v34 }
  0xe6   :  { %v472_v38 = vpop.f32.mrf.mxu0 }
  0xe7   :  { %v209_v39 = vadd.f32 %v471_v37, %v429_v36 }
  0xe8   :  { %v473_v40 = vpop.f32.mrf.mxu0 }
  0xe9   :  { %v474_v41 = vadd.f32 %v473_v40, %v472_v38  ;;  %v215_v42 = vmax.f32 %v209_v39, 0.0 }
  0xeb   :  { %v212_v43 = vadd.f32 %v474_v41, %v429_v36  ;;  %529 = vmatprep.mubr.f32.mxu1 %v215_v42 }
  0xed   :  { %v216_v44 = vmax.f32 %v212_v43, 0.0 }
  0xef   :  { %530 = vmatmul.mubr.f32.vlgmr.msra.gmra.mxu1 %v216_v44 }
  0xf0   :  { %533 = vmatpush3.msk.msra.mxu1 %vm333_vm0, %v318_v45 }
  0xf1   :  { %534 = vmatprep.subr.mxu1 %v317_v46 }
  0xf2   :  { %535 = vmatpush3.msra.mxu1 %v317_v46 }
 0x1af   :  { %v531_v48 = vpop.f32.mrf.mxu1 }
 0x1b0   :  { %v312_v49 = vadd.f32 %v531_v48, %v448_v47 }
 0x1b1   :  { %v306_v50 = vpop.f32.mrf.mxu1 }
 0x1b2   :  { %v307_v51 = vadd.f32 %v448_v47, %v306_v50  ;;  %v316_v53 = vmax.f32 %v312_v49, 0.0 }
 0x1b4   :  { %v315_v52 = vmax.f32 %v307_v51, 0.0 }
 0x1b6   :  { %536 = vmatprep.mubr.msk.f32.mxu1 %vm326_vm1, %v315_v52 }
 0x1b7   :  { %537 = vmatmul.mubr.msk.f32.vlgmr.msra.gmra.mxu1 %vm326_vm1, %v316_v53 }
 0x277   :  { %v538_v55 = vpop.f32.mrf.mxu1 }
 0x278   :  { %v409_v56 = vadd.f32 %v538_v55, %v449_v54 }
 0x279   :  { %v403_v57 = vpop.f32.mrf.mxu1 }
 0x27a   :  { %v413_v58 = vsub.f32 0.0, %v409_v56  ;;  %v404_v59 = vadd.f32 %v449_v54, %v403_v57 }
 0x27c   :  { %v416_v60 = vmul.f32 1.442695, %v413_v58  ;;  %v412_v61 = vsub.f32 0.0, %v404_v59 }
 0x27e   :  { %558 = vpow2.f32 %v416_v60  ;;  %v414_v62 = vmul.f32 1.442695, %v412_v61 }
 0x280   :  { %560 = vpow2.f32 %v414_v62 }
 0x28b   :  { %v559_v63 = vpop.eup %558 }
 0x28c   :  { %v419_v0 = vadd.f32 1.0, %v559_v63 }
 0x28d   :  { %v561_v1 = vpop.eup %560 }
 0x28e   :  { %562 = vrcp.f32 %v419_v0  ;;  %v418_v2 = vadd.f32 1.0, %v561_v1 }
 0x290   :  { %564 = vrcp.f32 %v418_v2 }
 0x29b   :  { %v563_v3 = vpop.eup %562 }
 0x29c   :  { %424 = vst.msk [vmem:[%s736_s7 + $0x8] sm:$0xff] %vm422_vm2, %v563_v3 }
 0x29d   :  { %v565_v4 = vpop.eup %564 }
 0x29e   :  { %423 = vst.msk [vmem:[%s736_s7] sm:$0xff] %vm422_vm2, %v565_v4 }

</bundles_post_ra>
